<compile_context>
chip_gen: v6e
topology: v6e:2x2x1
jax: 0.10.0
libtpu: 0.0.40
codegen_flags: <defaults>
</compile_context>

<pallas_src>
import functools

import jax
import jax.numpy as jnp
from jax import lax
from jax.experimental import pallas as pl
from jax.experimental.pallas import tpu as pltpu


def _round_up(x, m):
    return -(-x // m) * m


def _decoder_kernel(z_ref, w_ref, b_ref, out_ref, *, layer_specs):
    """4-layer MLP (3x ReLU) on one batch tile.

    z_ref   : (batch_tile, latent_dim)  batch-major input tile
    w_ref   : (Rpad, Cpad)              packed weights, layer l at rows
                                        [r : r+out_l), cols [0 : in_l)
    b_ref   : (Rpad, 1)                 packed biases (same row layout)
    out_ref : (orig_dim, batch_tile)    feature-major (lane-dense) output tile
    layer_specs: static tuple of (row_offset, out_dim, in_dim) per layer.
    """
    x = z_ref[...].astype(jnp.float32)                      # (Bt, latent)

    # Layer 1: contract the last dims of W1 (o,k) and x (Bt,k)  ->  (o, Bt).
    # This turns the batch-major input into feature-major activations with a
    # single MXU pass and no explicit transpose.
    r, o, k = layer_specs[0]
    h = lax.dot_general(
        w_ref[r:r + o, 0:k], x,
        (((1,), (1,)), ((), ())),
        preferred_element_type=jnp.float32) + b_ref[r:r + o, :]
    h = jnp.maximum(h, 0.0)

    # Middle layers: plain feature-major W @ H (+ bias, ReLU).
    for (r, o, k) in layer_specs[1:-1]:
        h = jnp.dot(w_ref[r:r + o, 0:k], h,
                    preferred_element_type=jnp.float32) + b_ref[r:r + o, :]
        h = jnp.maximum(h, 0.0)

    # Last layer: no activation.
    r, o, k = layer_specs[-1]
    h = jnp.dot(w_ref[r:r + o, 0:k], h,
                preferred_element_type=jnp.float32) + b_ref[r:r + o, :]

    out_ref[...] = h.astype(out_ref.dtype)                  # lane-dense store


def pack_decoder_lin_params(params, n_layers=4):
    """Consolidate w1..w4 / b1..b4 into two padded f32 blocks.

    params[f"w{i}"] has PyTorch-native shape (out, in); params[f"b{i}"] is (out,).
    Each layer's rows start at a multiple of 8 (sublane-aligned slices).
    Returns (wpack, bpack, layer_specs).
    """
    specs = []
    row = 0
    max_in = 1
    for i in range(1, n_layers + 1):
        o, k = params[f"w{i}"].shape
        specs.append((row, o, k))
        row += _round_up(o, 8)
        max_in = max(max_in, k)
    total_rows = _round_up(row, 8)
    cols = _round_up(max_in, 8)

    wpack = jnp.zeros((total_rows, cols), jnp.float32)
    bpack = jnp.zeros((total_rows, 1), jnp.float32)
    for i, (r, o, k) in enumerate(specs, start=1):
        wpack = wpack.at[r:r + o, 0:k].set(params[f"w{i}"].astype(jnp.float32))
        bpack = bpack.at[r:r + o, 0].set(params[f"b{i}"].astype(jnp.float32))
    return wpack, bpack, tuple(specs)


def decoder_lin_forward_t(z, wpack, bpack, layer_specs, *, batch_tile=1024):
    """Performance entry point.

    z: (B, latent_dim) batch-major.  Returns y_t: (orig_dim, B_pad) feature-major
    (batch on the 128-lane axis; lane-dense stores).  B_pad = ceil(B/tile)*tile.
    """
    B, latent_dim = z.shape
    orig_dim = layer_specs[-1][1]

    assert batch_tile % 128 == 0, "batch_tile must be a multiple of 128 lanes"
    n_tiles = pl.cdiv(B, batch_tile)
    B_pad = n_tiles * batch_tile
    if B_pad != B:
        # Ragged batch: pad in the wrapper (cheaper than in-kernel masking for
        # a memory-bound kernel); caller slices the result back to B.
        z = jnp.pad(z, ((0, B_pad - B), (0, 0)))

    kernel = functools.partial(_decoder_kernel, layer_specs=layer_specs)

    return pl.pallas_call(
        kernel,
        out_shape=jax.ShapeDtypeStruct((orig_dim, B_pad), jnp.float32),
        grid_spec=pltpu.PrefetchScalarGridSpec(
            num_scalar_prefetch=0,
            grid=(n_tiles,),
            in_specs=[
                # Batch tile of z: (batch_tile, latent) -- full-width rows, so
                # the HBM read is contiguous and carries no padding.
                pl.BlockSpec((batch_tile, latent_dim), lambda i: (i, 0)),
                # Packed weights / biases: single full block, constant index
                # map -> resident in VMEM, no per-step re-DMA.
                pl.BlockSpec(wpack.shape, lambda i: (0, 0)),
                pl.BlockSpec(bpack.shape, lambda i: (0, 0)),
            ],
            # Feature-major output tile: last dim = batch_tile (multiple of
            # 128) -> unmasked, lane-dense vector stores.
            out_specs=pl.BlockSpec((orig_dim, batch_tile), lambda i: (0, i)),
        ),
        compiler_params=pltpu.CompilerParams(
            # Independent batch tiles: shard across TensorCores (v7x megacore).
            dimension_semantics=("parallel",),
        ),
    )(z, wpack, bpack)


def decoder_lin_forward(z, params, *, batch_tile=1024):
    """PyTorch-compatible wrapper: (B, latent_dim) -> (B, orig_dim)."""
    B = z.shape[0]
    wpack, bpack, specs = pack_decoder_lin_params(params)
    y_t = decoder_lin_forward_t(z, wpack, bpack, specs, batch_tile=batch_tile)
    # Layout plumbing back to batch-major; fused pipelines should consume y_t
    # directly via decoder_lin_forward_t and skip this transpose.
    return y_t[:, :B].T


def init_decoder_lin_params(key, orig_dim=10, latent_dim=2, hidden_dim=6,
                            dtype=jnp.float32):
    """Deterministic synthetic params matching DecoderLin.__init__.

    Weights stored PyTorch-native: w{i} is (out, in), b{i} is (out,).
    """
    dims = [
        (latent_dim, hidden_dim),        # lin1
        (hidden_dim, 2 * hidden_dim),    # lin2
        (2 * hidden_dim, hidden_dim),    # lin3
        (hidden_dim, orig_dim),          # lin4
    ]
    params = {}
    for idx, (fan_in, fan_out) in enumerate(dims, start=1):
        key, kw, kb = jax.random.split(key, 3)
        bound = 1.0 / float(fan_in) ** 0.5
        params[f"w{idx}"] = jax.random.uniform(
            kw, (fan_out, fan_in), dtype=dtype, minval=-bound, maxval=bound)
        params[f"b{idx}"] = jax.random.uniform(
            kb, (fan_out,), dtype=dtype, minval=-bound, maxval=bound)
    return params


def decoder_lin_reference(z, params):
    """Pure-JAX reference of the PyTorch forward (z @ W.T + b)."""
    h = jnp.maximum(z @ params["w1"].T + params["b1"], 0.0)
    h = jnp.maximum(h @ params["w2"].T + params["b2"], 0.0)
    h = jnp.maximum(h @ params["w3"].T + params["b3"], 0.0)
    return h @ params["w4"].T + params["b4"]


if __name__ == "__main__":
    key = jax.random.PRNGKey(0)
    k_params, k_z = jax.random.split(key)

    orig_dim, latent_dim, hidden_dim = 10, 2, 6
    batch = 2500          # intentionally ragged: exercises the pad-to-tile path
    batch_tile = 512      # multiple of 256 -> grid=(5,): pipelined + megacore

    params = init_decoder_lin_params(
        k_params, orig_dim=orig_dim, latent_dim=latent_dim, hidden_dim=hidden_dim)
    z = jax.random.normal(k_z, (batch, latent_dim), dtype=jnp.float32)

    out = decoder_lin_forward(z, params, batch_tile=batch_tile)
    out = jax.block_until_ready(out)

    ref = decoder_lin_reference(z, params)
    assert out.shape == (batch, orig_dim), out.shape
    assert jnp.allclose(out, ref, atol=1e-5, rtol=1e-5), "mismatch vs reference"

    print("KERNEL_OK")
</pallas_src>

<mosaic_0001>
module attributes {stable_mosaic.version = 11 : i64} {
  func.func @_decoder_kernel(%arg0: i32, %arg1: memref<512x2xf32, #tpu.memory_space<vmem>>, %arg2: memref<48x16xf32, #tpu.memory_space<vmem>>, %arg3: memref<48x1xf32, #tpu.memory_space<vmem>>, %arg4: memref<10x512xf32, #tpu.memory_space<vmem>>) attributes {dimension_semantics = [#tpu.dimension_semantics<parallel>], iteration_bounds = array<i64: 5>, scalar_prefetch = 0 : i64, scratch_operands = 0 : i64, tpu.core_type = #tpu.core_type<tc>, window_params = [{transform_indices = @transform_0, window_bounds = array<i64: 512, 2>}, {pipeline_mode = #tpu.pipeline_mode<synchronous>, transform_indices = @transform_1, window_bounds = array<i64: 48, 16>}, {pipeline_mode = #tpu.pipeline_mode<synchronous>, transform_indices = @transform_2, window_bounds = array<i64: 48, 1>}, {transform_indices = @transform_3, window_bounds = array<i64: 10, 512>}]} {
    %c0 = arith.constant 0 : index
    %c0_0 = arith.constant 0 : index
    %0 = vector.load %arg1[%c0, %c0_0] : memref<512x2xf32, #tpu.memory_space<vmem>>, vector<512x2xf32>
    %c0_1 = arith.constant 0 : index
    %c0_2 = arith.constant 0 : index
    %1 = vector.load %arg2[%c0_1, %c0_2] : memref<48x16xf32, #tpu.memory_space<vmem>>, vector<6x2xf32>
    %cst = arith.constant dense<0.000000e+00> : vector<6x512xf32>
    %2 = tpu.matmul %1, %0, %cst {dimension_numbers = #tpu.dot_dimension_numbers<[1], [1], [0], [0], [0, 0, 1, 0], [], []>} : vector<6x2xf32>, vector<512x2xf32>, vector<6x512xf32> -> vector<6x512xf32>
    %c0_3 = arith.constant 0 : index
    %c0_4 = arith.constant 0 : index
    %3 = vector.load %arg3[%c0_3, %c0_4] : memref<48x1xf32, #tpu.memory_space<vmem>>, vector<6x1xf32>
    %4 = vector.broadcast %3 : vector<6x1xf32> to vector<6x512xf32>
    %5 = arith.addf %2, %4 : vector<6x512xf32>
    %cst_5 = arith.constant 0.000000e+00 : f32
    %6 = vector.broadcast %cst_5 : f32 to vector<6x512xf32>
    %7 = arith.maximumf %5, %6 : vector<6x512xf32>
    %c8 = arith.constant 8 : index
    %c0_6 = arith.constant 0 : index
    %8 = vector.load %arg2[%c8, %c0_6] : memref<48x16xf32, #tpu.memory_space<vmem>>, vector<12x6xf32>
    %cst_7 = arith.constant dense<0.000000e+00> : vector<12x512xf32>
    %9 = tpu.matmul %8, %7, %cst_7 {dimension_numbers = #tpu.dot_dimension_numbers<[1], [0], [0], [1], [0, 0, 1, 1], [], []>} : vector<12x6xf32>, vector<6x512xf32>, vector<12x512xf32> -> vector<12x512xf32>
    %c8_8 = arith.constant 8 : index
    %c0_9 = arith.constant 0 : index
    %10 = vector.load %arg3[%c8_8, %c0_9] : memref<48x1xf32, #tpu.memory_space<vmem>>, vector<12x1xf32>
    %11 = vector.broadcast %10 : vector<12x1xf32> to vector<12x512xf32>
    %12 = arith.addf %9, %11 : vector<12x512xf32>
    %cst_10 = arith.constant 0.000000e+00 : f32
    %13 = vector.broadcast %cst_10 : f32 to vector<12x512xf32>
    %14 = arith.maximumf %12, %13 : vector<12x512xf32>
    %c24 = arith.constant 24 : index
    %c0_11 = arith.constant 0 : index
    %15 = vector.load %arg2[%c24, %c0_11] : memref<48x16xf32, #tpu.memory_space<vmem>>, vector<6x12xf32>
    %cst_12 = arith.constant dense<0.000000e+00> : vector<6x512xf32>
    %16 = tpu.matmul %15, %14, %cst_12 {dimension_numbers = #tpu.dot_dimension_numbers<[1], [0], [0], [1], [0, 0, 1, 1], [], []>} : vector<6x12xf32>, vector<12x512xf32>, vector<6x512xf32> -> vector<6x512xf32>
    %c24_13 = arith.constant 24 : index
    %c0_14 = arith.constant 0 : index
    %17 = vector.load %arg3[%c24_13, %c0_14] : memref<48x1xf32, #tpu.memory_space<vmem>>, vector<6x1xf32>
    %18 = vector.broadcast %17 : vector<6x1xf32> to vector<6x512xf32>
    %19 = arith.addf %16, %18 : vector<6x512xf32>
    %cst_15 = arith.constant 0.000000e+00 : f32
    %20 = vector.broadcast %cst_15 : f32 to vector<6x512xf32>
    %21 = arith.maximumf %19, %20 : vector<6x512xf32>
    %c32 = arith.constant 32 : index
    %c0_16 = arith.constant 0 : index
    %22 = vector.load %arg2[%c32, %c0_16] : memref<48x16xf32, #tpu.memory_space<vmem>>, vector<10x6xf32>
    %cst_17 = arith.constant dense<0.000000e+00> : vector<10x512xf32>
    %23 = tpu.matmul %22, %21, %cst_17 {dimension_numbers = #tpu.dot_dimension_numbers<[1], [0], [0], [1], [0, 0, 1, 1], [], []>} : vector<10x6xf32>, vector<6x512xf32>, vector<10x512xf32> -> vector<10x512xf32>
    %c32_18 = arith.constant 32 : index
    %c0_19 = arith.constant 0 : index
    %24 = vector.load %arg3[%c32_18, %c0_19] : memref<48x1xf32, #tpu.memory_space<vmem>>, vector<10x1xf32>
    %25 = vector.broadcast %24 : vector<10x1xf32> to vector<10x512xf32>
    %26 = arith.addf %23, %25 : vector<10x512xf32>
    %c0_20 = arith.constant 0 : index
    %c0_21 = arith.constant 0 : index
    %27 = vector.load %arg4[%c0_20, %c0_21] : memref<10x512xf32, #tpu.memory_space<vmem>>, vector<10x512xf32>
    tpu.vector_store %arg4[%c0_20, %c0_21], %26 {strides = array<i32>} : memref<10x512xf32, #tpu.memory_space<vmem>>, vector<10x512xf32>,
    return
  }
  func.func @transform_0(%arg0: i32) -> (i32, i32) {
    %c0_i32 = arith.constant 0 : i32
    %c0_i32_0 = arith.constant 0 : i32
    return %arg0, %c0_i32 : i32, i32
  }
  func.func @transform_1(%arg0: i32) -> (i32, i32) {
    %c0_i32 = arith.constant 0 : i32
    %c0_i32_0 = arith.constant 0 : i32
    %c0_i32_1 = arith.constant 0 : i32
    return %c0_i32, %c0_i32_0 : i32, i32
  }
  func.func @transform_2(%arg0: i32) -> (i32, i32) {
    %c0_i32 = arith.constant 0 : i32
    %c0_i32_0 = arith.constant 0 : i32
    %c0_i32_1 = arith.constant 0 : i32
    return %c0_i32, %c0_i32_0 : i32, i32
  }
  func.func @transform_3(%arg0: i32) -> (i32, i32) {
    %c0_i32 = arith.constant 0 : i32
    %c0_i32_0 = arith.constant 0 : i32
    return %c0_i32, %arg0 : i32, i32
  }
}

</mosaic_0001>

<bundles_post_ra>
// kernel: tpu_custom_call.1
= control target key start
LH: loop header
LB: loop body
LE: loop exit
PB: predicated region body
PF: predicated region fallthrough
CT: control target
= control target key end

     0   :  { %8 = vsyncpa [#allocation3], 0  ;;  %s1831_s0 = inlined_call_operand.vmem [shape: f32[2560,2], index: 0, kind: input, shape index: {}]   ;;  %s1832_s1 = inlined_call_operand.vmem [shape: f32[48,16], index: 1, kind: input, shape index: {}]   ;;  %s1833_s2 = inlined_call_operand.vmem [shape: f32[48,1], index: 2, kind: input, shape index: {}]   ;;  %s1834_s3 = inlined_call_operand.hbm [shape: f32[10,2560], index: 3, kind: output, shape index: {}]  }
   0x1   :  { %10 = vsyncpa [#allocation3 + $0x1], 0  ;;  %s1524_s12 = smov 0   ;;  %s1526_s13 = smov 0  }
   0x2   :  { %s1528_s14 = smov 0   ;;  %s1530_s15 = smov 0  }
   0x3 LB: > { %s1545_s16 = sadd.s32 4294967295, %s1496_s15   ;;  %s1221_s17 = sadd.s32 4294967294, %s1496_s15   ;;  %s1496_s15 = sphi %s1530_s15, %s1840_s15   ;;  %s1492_s14 = sphi %s1528_s14, %s1839_s14   ;;  %s1488_s13 = sphi %s1526_s13, %s1838_s13   ;;  %s1484_s12 = sphi %s1524_s12, %s1837_s12  }
   0x4   : > { %s1549_s18 = sadd.s32 1, %s1496_s15   ;;  %s91_s19 = sadd.s32 1, %s1492_s14 }
   0x5   : > { %s88_s20 = ssub.s32 %s1496_s15, %s1549_s18  ;;  %p101_p0 = scmp.ne.s32.totalorder %s1492_s14, %s1488_s13 }
   0x6   : > { %p89_p1 = scmp.eq.s32.totalorder %s88_s20, 0  ;;  %p102_p2 = scmp.eq.s32.totalorder %s1545_s16, 4 }
   0x7   : > { %p107_p3 = scmp.ne.s32.totalorder %s1488_s13, %s1484_s12  ;;  %p108_p4 = scmp.eq.s32.totalorder %s1221_s17, 4 }
   0x8   : > { %s1560_s21 = scalar_select %p89_p1, %s1492_s14, %s91_s19  }
   0x9   : > { %p1562_p5 = por %p102_p2, %p101_p0  ;;  %p1566_p6 = por %p108_p4, %p107_p3 }
   0xa   : > { %p1224_p7 = scmp.ge.s32.totalorder %s1496_s15, 1  ;;  %p141_p8 = scmp.lt.s32.totalorder %s1496_s15, 6 }
   0xc   : > { %p142_p9 = pnand %p1224_p7, %p141_p8 }
   0xd   : > { %s1226_s24 = sshll.u32 (!%p142_p9), %s1545_s16, 6  ;;  %s162_s8 = sand.u32 (!%p142_p9), 1, %s1488_s13  }
   0xe   : > { %145 = sbr.rel (%p142_p9) target bundleno = 914 (0x392), region = 32  ;;  %p166_p10 = scmp.lt.s32.totalorder (!%p142_p9), %s1226_s24, 319 }
   0xf   : > { %s1225_s9 = sshll.u32 (!%p142_p9), %s162_s8, 6  ;;  %s1321_s17 = sshll.u32 (!%p142_p9), %s1545_s16, 9 }
  0x10   : > { %s164_s10 = scalar_lea.vmem (!%p142_p9), [#allocation2], %s1225_s9  ;;  %s1791_s16 = scalar_lea.sflag (!%p142_p9), [#allocation3], %s162_s8 }
  0x11   : > { %s1159_s11 = sshll.u32 (!%p142_p9), %s164_s10, 4  ;;  %s1500_s26 = smov (!%p142_p9), [#allocation2]   ;;  %s1782_s11 = int_to_ptr.vmem [resolvable:$true] %s1159_s11 }
  0x12   : > { %s1436_s25 = scalar_lea.vmem (!%p142_p9), %s1782_s11, 1024  ;;  %s1440_s27 = sshll.u32 (!%p142_p9), %s1500_s26, 4  ;;  %s1441_s27 = int_to_ptr.vmem [resolvable:$false] %s1440_s27 }
  0x13   : > { %vm243_vm0 = vcmask 15360   ;;  %v1576_v0 = vld [vmem:[%s1832_s1] sm:$0x3f]  ;;  %v1498_v2 = vmov 0   ;;  %s1842_s24 = smov (!%p166_p10, %s1226_s24), 319  ;;  %vm606_vm1 = vcmask 1045504   ;;  %p1437_p11 = scmp.ne.s32.totalorder %s1782_s11, %s1436_s25 }
  0x14   : > { %1354 = vmatprep.mubr.msk.f32.mxu0 %vm243_vm0, %v1576_v0  ;;  %1388 = vmatprep.mubr.msk.f32.mxu1 %vm243_vm0, %v1576_v0  ;;  %v237_v1 = vld [vmem:[%s1833_s2] sm:$0x3f]  ;;  %v588_v3 = vld [vmem:[%s1833_s2 + $0x10] sm:$0xf]  ;;  %s1227_s4 = sshll.u32 %s1842_s24, 3  ;;  %vm599_vm2 = vcmask 48128   ;;  %s1787_s24 = scalar_lea.hbm %s1834_s3, %s1321_s17 }
  0x15   : > { %1434 = vset.pattern.permute.xlu0 %v1498_v2  ;;  %1435 = vset.pattern.permute.xlu1 %v1498_v2  ;;  %s1591_s7 = scalar_lea.vmem %s1831_s0, %s1227_s4  ;;  %v953_v4 = vld [vmem:[%s1833_s2 + $0x20] sm:$0xff]  ;;  %vm792_vm3 = vcmask 1043456   ;;  %vm788_vm4 = vcmask 97280   ;;  %p1438_p12 = pnand %p1437_p11, %p1562_p5 }
  0x16   : > { %240 = vperm.xlu0 %1434, %v237_v1   ;;  %v203_v5 = vld [vmem:[%s1591_s7 + $0xf8] sm:$0xff]  ;;  %v202_v9 = vld [vmem:[%s1591_s7 + $0xf0] sm:$0xff]  ;;  %v201_v13 = vld [vmem:[%s1591_s7 + $0xe8] sm:$0xff]  ;;  %s1442_s28 = scalar_lea.vmem %s1441_s27, 2048  ;;  %p1443_p0 = scmp.lt.s32.totalorder %s1782_s11, %s1441_s27 }
  0x17   : > { %v235_v6 = vld [vmem:[%s1591_s7 + $0x1f8] sm:$0xff]  ;;  %1322 = vmatprep.subr.msk.mxu0 %vm243_vm0, %v203_v5  ;;  %v234_v10 = vld [vmem:[%s1591_s7 + $0x1f0] sm:$0xff]  ;;  %v233_v14 = vld [vmem:[%s1591_s7 + $0x1e8] sm:$0xff]  ;;  %p1439_p13 = pneg %p1438_p12  ;;  %p1444_p1 = scmp.lt.s32.totalorder %s1442_s28, %s1436_s25 }
  0x18   : > { %v187_v7 = vld [vmem:[%s1591_s7 + $0x78] sm:$0xff]  ;;  %1356 = vmatprep.subr.msk.mxu1 %vm243_vm0, %v235_v6  ;;  %v186_v11 = vld [vmem:[%s1591_s7 + $0x70] sm:$0xff]  ;;  %v185_v15 = vld [vmem:[%s1591_s7 + $0x68] sm:$0xff]  ;;  %v1499_v6 = vmov 0.0  }
  0x19   : > { %v219_v8 = vld [vmem:[%s1591_s7 + $0x178] sm:$0xff]  ;;  %1323 = vmatpush3.xpose.msk.msra.mxu0 %vm243_vm0, %v187_v7  ;;  %v218_v12 = vld [vmem:[%s1591_s7 + $0x170] sm:$0xff]  ;;  %v217_v16 = vld [vmem:[%s1591_s7 + $0x168] sm:$0xff]  ;;  %p1445_p2 = por %p1444_p1, %p1443_p0 }
  0x1a   : > { %596 = vperm.xlu0 %1434, %v588_v3   ;;  %1357 = vmatpush3.xpose.msk.msra.mxu1 %vm243_vm0, %v219_v8  ;;  %v200_v17 = vld [vmem:[%s1591_s7 + $0xe0] sm:$0xff]  ;;  %v199_v21 = vld [vmem:[%s1591_s7 + $0xd8] sm:$0xff]  ;;  %v198_v25 = vld [vmem:[%s1591_s7 + $0xd0] sm:$0xff] }
  0x1b   : > { %1324 = vmatprep.subr.msk.mxu0 %vm243_vm0, %v202_v9  ;;  %1358 = vmatprep.subr.msk.mxu1 %vm243_vm0, %v234_v10  ;;  %v232_v18 = vld [vmem:[%s1591_s7 + $0x1e0] sm:$0xff]  ;;  %v231_v22 = vld [vmem:[%s1591_s7 + $0x1d8] sm:$0xff]  ;;  %v230_v26 = vld [vmem:[%s1591_s7 + $0x1d0] sm:$0xff]  ;;  %p1446_p3 = pnand %p1445_p2, %p1439_p13 }
  0x1c   : > { %v184_v19 = vld [vmem:[%s1591_s7 + $0x60] sm:$0xff]  ;;  %v183_v23 = vld [vmem:[%s1591_s7 + $0x58] sm:$0xff]  ;;  %v182_v27 = vld [vmem:[%s1591_s7 + $0x50] sm:$0xff] }
  0x1d   : > { %1325 = vmatpush3.xpose.msk.msra.mxu0 %vm243_vm0, %v186_v11  ;;  %v216_v20 = vld [vmem:[%s1591_s7 + $0x160] sm:$0xff]  ;;  %v215_v24 = vld [vmem:[%s1591_s7 + $0x158] sm:$0xff]  ;;  %v214_v28 = vld [vmem:[%s1591_s7 + $0x150] sm:$0xff] }
  0x1e   : > { %957 = vperm.xlu0 %1434, %v953_v4   ;;  %1359 = vmatpush3.xpose.msk.msra.mxu1 %vm243_vm0, %v218_v12  ;;  %v197_v29 = vld [vmem:[%s1591_s7 + $0xc8] sm:$0xff]  ;;  %v196_v33 = vld [vmem:[%s1591_s7 + $0xc0] sm:$0xff]  ;;  %v195_v37 = vld [vmem:[%s1591_s7 + $0xb8] sm:$0xff] }
  0x1f   : > { %1326 = vmatprep.subr.msk.mxu0 %vm243_vm0, %v201_v13  ;;  %1360 = vmatprep.subr.msk.mxu1 %vm243_vm0, %v233_v14  ;;  %v229_v30 = vld [vmem:[%s1591_s7 + $0x1c8] sm:$0xff]  ;;  %v228_v34 = vld [vmem:[%s1591_s7 + $0x1c0] sm:$0xff]  ;;  %v227_v38 = vld [vmem:[%s1591_s7 + $0x1b8] sm:$0xff] }
  0x20   : > { %v181_v31 = vld [vmem:[%s1591_s7 + $0x48] sm:$0xff]  ;;  %v180_v35 = vld [vmem:[%s1591_s7 + $0x40] sm:$0xff]  ;;  %v179_v39 = vld [vmem:[%s1591_s7 + $0x38] sm:$0xff] }
  0x21   : > { %1327 = vmatpush3.xpose.msk.msra.mxu0 %vm243_vm0, %v185_v15  ;;  %v213_v32 = vld [vmem:[%s1591_s7 + $0x148] sm:$0xff]  ;;  %v212_v36 = vld [vmem:[%s1591_s7 + $0x140] sm:$0xff]  ;;  %v211_v40 = vld [vmem:[%s1591_s7 + $0x138] sm:$0xff] }
  0x22   : > { %1361 = vmatpush3.xpose.msk.msra.mxu1 %vm243_vm0, %v217_v16  ;;  %1328 = vmatprep.subr.msk.mxu0 %vm243_vm0, %v200_v17  ;;  %v194_v41 = vld [vmem:[%s1591_s7 + $0xb0] sm:$0xff]  ;;  %v193_v45 = vld [vmem:[%s1591_s7 + $0xa8] sm:$0xff]  ;;  %v192_v49 = vld [vmem:[%s1591_s7 + $0xa0] sm:$0xff] }
  0x23   : > { %1362 = vmatprep.subr.msk.mxu1 %vm243_vm0, %v232_v18  ;;  %v226_v42 = vld [vmem:[%s1591_s7 + $0x1b0] sm:$0xff]  ;;  %v225_v46 = vld [vmem:[%s1591_s7 + $0x1a8] sm:$0xff]  ;;  %v224_v50 = vld [vmem:[%s1591_s7 + $0x1a0] sm:$0xff] }
  0x24   : > { %v178_v43 = vld [vmem:[%s1591_s7 + $0x30] sm:$0xff]  ;;  %v177_v47 = vld [vmem:[%s1591_s7 + $0x28] sm:$0xff]  ;;  %v176_v51 = vld [vmem:[%s1591_s7 + $0x20] sm:$0xff] }
  0x25   : > { %1329 = vmatpush3.xpose.msk.msra.mxu0 %vm243_vm0, %v184_v19  ;;  %v210_v44 = vld [vmem:[%s1591_s7 + $0x130] sm:$0xff]  ;;  %v209_v48 = vld [vmem:[%s1591_s7 + $0x128] sm:$0xff]  ;;  %v208_v52 = vld [vmem:[%s1591_s7 + $0x120] sm:$0xff] }
  0x26   : > { %1363 = vmatpush3.xpose.msk.msra.mxu1 %vm243_vm0, %v216_v20  ;;  %1330 = vmatprep.subr.msk.mxu0 %vm243_vm0, %v199_v21  ;;  %v191_v53 = vld [vmem:[%s1591_s7 + $0x98] sm:$0xff]  ;;  %v190_v57 = vld [vmem:[%s1591_s7 + $0x90] sm:$0xff]  ;;  %v189_v61 = vld [vmem:[%s1591_s7 + $0x88] sm:$0xff] }
  0x27   : > { %1364 = vmatprep.subr.msk.mxu1 %vm243_vm0, %v231_v22  ;;  %v223_v54 = vld [vmem:[%s1591_s7 + $0x198] sm:$0xff]  ;;  %v222_v58 = vld [vmem:[%s1591_s7 + $0x190] sm:$0xff]  ;;  %v221_v62 = vld [vmem:[%s1591_s7 + $0x188] sm:$0xff] }
  0x28   : > { %v175_v55 = vld [vmem:[%s1591_s7 + $0x18] sm:$0xff]  ;;  %v174_v59 = vld [vmem:[%s1591_s7 + $0x10] sm:$0xff]  ;;  %v173_v63 = vld [vmem:[%s1591_s7 + $0x8] sm:$0xff] }
  0x29   : > { %1331 = vmatpush3.xpose.msk.msra.mxu0 %vm243_vm0, %v183_v23  ;;  %v207_v56 = vld [vmem:[%s1591_s7 + $0x118] sm:$0xff]  ;;  %v206_v60 = vld [vmem:[%s1591_s7 + $0x110] sm:$0xff]  ;;  %v205_v1 = vld [vmem:[%s1591_s7 + $0x108] sm:$0xff] }
  0x2a   : > { %1365 = vmatpush3.xpose.msk.msra.mxu1 %vm243_vm0, %v215_v24  ;;  %1332 = vmatprep.subr.msk.mxu0 %vm243_vm0, %v198_v25  ;;  %v188_v2 = vld [vmem:[%s1591_s7 + $0x80] sm:$0xff]  ;;  %v587_v7 = vld [vmem:[%s1833_s2 + $0x8] sm:$0xff]  ;;  %v782_v8 = vld [vmem:[%s1833_s2 + $0x18] sm:$0x3f] }
  0x2b   : > { %1366 = vmatprep.subr.msk.mxu1 %vm243_vm0, %v230_v26  ;;  %v220_v3 = vld [vmem:[%s1591_s7 + $0x180] sm:$0xff]  ;;  %591 = vperm.xlu1 %1435, %v587_v7   ;;  %v954_v9 = vld [vmem:[%s1833_s2 + $0x28] sm:$0x3]  ;;  %v586_v23 = vld [vmem:[%s1832_s1 + $0x10] sm:$0xf] }
  0x2c   : > { %v172_v4 = vld [vmem:[%s1591_s7] sm:$0xff]  ;;  %v585_v22 = vld [vmem:[%s1832_s1 + $0x8] sm:$0xff] }
  0x2d   : > { %1333 = vmatpush3.xpose.msk.msra.mxu0 %vm243_vm0, %v182_v27  ;;  %v204_v5 = vld [vmem:[%s1591_s7 + $0x100] sm:$0xff] }
  0x2e   : > { %1367 = vmatpush3.xpose.msk.msra.mxu1 %vm243_vm0, %v214_v28  ;;  %1334 = vmatprep.subr.msk.mxu0 %vm243_vm0, %v197_v29 }
  0x2f   : > { %1368 = vmatprep.subr.msk.mxu1 %vm243_vm0, %v229_v30  ;;  %785 = vperm.xlu1 %1435, %v782_v8  }
  0x31   : > { %1335 = vmatpush3.xpose.msk.msra.mxu0 %vm243_vm0, %v181_v31 }
  0x32   : > { %1369 = vmatpush3.xpose.msk.msra.mxu1 %vm243_vm0, %v213_v32  ;;  %1336 = vmatprep.subr.msk.mxu0 %vm243_vm0, %v196_v33 }
  0x33   : > { %1370 = vmatprep.subr.msk.mxu1 %vm243_vm0, %v228_v34  ;;  %962 = vperm.xlu1 %1435, %v954_v9  }
  0x35   : > { %1337 = vmatpush3.xpose.msk.msra.mxu0 %vm243_vm0, %v180_v35 }
  0x36   : > { %1371 = vmatpush3.xpose.msk.msra.mxu1 %vm243_vm0, %v212_v36  ;;  %1338 = vmatprep.subr.msk.mxu0 %vm243_vm0, %v195_v37 }
  0x37   : > { %1372 = vmatprep.subr.msk.mxu1 %vm243_vm0, %v227_v38 }
  0x39   : > { %1339 = vmatpush3.xpose.msk.msra.mxu0 %vm243_vm0, %v179_v39 }
  0x3a   : > { %1373 = vmatpush3.xpose.msk.msra.mxu1 %vm243_vm0, %v211_v40  ;;  %1340 = vmatprep.subr.msk.mxu0 %vm243_vm0, %v194_v41 }
  0x3b   : > { %1374 = vmatprep.subr.msk.mxu1 %vm243_vm0, %v226_v42 }
  0x3d   : > { %1341 = vmatpush3.xpose.msk.msra.mxu0 %vm243_vm0, %v178_v43 }
  0x3e   : > { %1375 = vmatpush3.xpose.msk.msra.mxu1 %vm243_vm0, %v210_v44  ;;  %1342 = vmatprep.subr.msk.mxu0 %vm243_vm0, %v193_v45 }
  0x3f   : > { %1376 = vmatprep.subr.msk.mxu1 %vm243_vm0, %v225_v46 }
  0x41   : > { %1343 = vmatpush3.xpose.msk.msra.mxu0 %vm243_vm0, %v177_v47 }
  0x42   : > { %1377 = vmatpush3.xpose.msk.msra.mxu1 %vm243_vm0, %v209_v48  ;;  %1344 = vmatprep.subr.msk.mxu0 %vm243_vm0, %v192_v49 }
  0x43   : > { %1378 = vmatprep.subr.msk.mxu1 %vm243_vm0, %v224_v50  ;;  %v781_v50 = vld [vmem:[%s1832_s1 + $0x18] sm:$0x3f] }
  0x45   : > { %1345 = vmatpush3.xpose.msk.msra.mxu0 %vm243_vm0, %v176_v51 }
  0x46   : > { %1379 = vmatpush3.xpose.msk.msra.mxu1 %vm243_vm0, %v208_v52  ;;  %1346 = vmatprep.subr.msk.mxu0 %vm243_vm0, %v191_v53 }
  0x47   : > { %1380 = vmatprep.subr.msk.mxu1 %vm243_vm0, %v223_v54 }
  0x49   : > { %1347 = vmatpush3.xpose.msk.msra.mxu0 %vm243_vm0, %v175_v55 }
  0x4a   : > { %1381 = vmatpush3.xpose.msk.msra.mxu1 %vm243_vm0, %v207_v56  ;;  %1348 = vmatprep.subr.msk.mxu0 %vm243_vm0, %v190_v57 }
  0x4b   : > { %1382 = vmatprep.subr.msk.mxu1 %vm243_vm0, %v222_v58 }
  0x4d   : > { %1349 = vmatpush3.xpose.msk.msra.mxu0 %vm243_vm0, %v174_v59 }
  0x4e   : > { %1383 = vmatpush3.xpose.msk.msra.mxu1 %vm243_vm0, %v206_v60  ;;  %1350 = vmatprep.subr.msk.mxu0 %vm243_vm0, %v189_v61 }
  0x4f   : > { %1384 = vmatprep.subr.msk.mxu1 %vm243_vm0, %v221_v62 }
  0x51   : > { %1351 = vmatpush3.xpose.msk.msra.mxu0 %vm243_vm0, %v173_v63 }
  0x52   : > { %1385 = vmatpush3.xpose.msk.msra.mxu1 %vm243_vm0, %v205_v1  ;;  %1352 = vmatprep.subr.msk.mxu0 %vm243_vm0, %v188_v2  ;;  %v951_v1 = vld [vmem:[%s1832_s1 + $0x20] sm:$0xff]  ;;  %v952_v2 = vld [vmem:[%s1832_s1 + $0x28] sm:$0x3] }
  0x53   : > { %1386 = vmatprep.subr.msk.mxu1 %vm243_vm0, %v220_v3 }
  0x55   : > { %1353 = vmatpush3.xpose.msk.msra.mxu0 %vm243_vm0, %v172_v4 }
  0x56   : > { %1387 = vmatpush3.xpose.msk.msra.mxu1 %vm243_vm0, %v204_v5 }
  0x58   : > { %1355 = vmatmul.mubr.msk.f32.vlgmr.msra.gmra.mxu0 %vm243_vm0, %v1576_v0 }
  0x59   : > { %1389 = vmatmul.mubr.msk.f32.vlgmr.msra.gmra.mxu1 %vm243_vm0, %v1576_v0  ;;  %683 = vmatprep.mubr.f32.mxu0 %v1499_v6 }
  0x5a   : > { %760 = vmatprep.mubr.f32.mxu1 %v1499_v6 }
  0x91   : > { %v241_v11 = vpop.permute.xlu0 %240 }
  0x95   : > { %v597_v30 = vpop.permute.xlu0 %596 }
  0x99   : > { %v958_v3 = vpop.permute.xlu0 %957 }
  0xa6   : > { %v592_v31 = vpop.permute.xlu1 %591 }
  0xaa   : > { %v786_v53 = vpop.permute.xlu1 %785 }
 0x118   : > { %v505_v0 = vpop.f32.mrf.mxu0 }
 0x119   : > { %v576_v10 = vpop.f32.mrf.mxu1  ;;  %v506_v12 = vadd.f32 %v505_v0, %v241_v11  ;;  %v963_v0 = vpop.permute.xlu1 %962 }
 0x11a   : > { %v577_v13 = vadd.f32 %v576_v10, %v241_v11  ;;  %v507_v14 = vpop.f32.mrf.mxu0 }
 0x11b   : > { %v578_v15 = vpop.f32.mrf.mxu1  ;;  %v508_v16 = vadd.f32 %v507_v14, %v241_v11  ;;  %v581_v20 = vmax.f32 %v506_v12, 0.0 }
 0x11c   : > { %v579_v17 = vadd.f32 %v578_v15, %v241_v11  ;;  %v583_v21 = vmax.f32 %v577_v13, 0.0 }
 0x11d   : > { %v582_v18 = vmax.f32 %v508_v16, 0.0 }
 0x11e   : > { %v584_v19 = vmax.f32 %v579_v17, 0.0 }
 0x11f   : > { %1294 = vmatprep.subr.msk.mxu0 %vm606_vm1, %v582_v18 }
 0x120   : > { %1298 = vmatprep.subr.msk.mxu1 %vm606_vm1, %v584_v19  ;;  %1295 = vmatpush1.msk.msra.mxu0 %vm606_vm1, %v581_v20 }
 0x121   : > { %1299 = vmatpush1.msk.msra.mxu1 %vm606_vm1, %v583_v21  ;;  %1296 = vmatmul.mubr.msk.f32.vlgmr.msra.gmra.mxu0 %vm599_vm2, %v585_v22 }
 0x122   : > { %1300 = vmatmul.mubr.msk.f32.vlgmr.msra.gmra.mxu1 %vm599_vm2, %v585_v22  ;;  %689 = vmatprep.mubr.f32.mxu0 %v1499_v6 }
 0x123   : > { %766 = vmatprep.mubr.f32.mxu1 %v1499_v6 }
 0x125   : > { %1297 = vmatmul.mubr.msk.f32.gmra.mxu0 %vm599_vm2, %v586_v23 }
 0x126   : > { %1301 = vmatmul.mubr.msk.f32.gmra.mxu1 %vm599_vm2, %v586_v23  ;;  %869 = vmatprep.mubr.f32.mxu0 %v1499_v6 }
 0x127   : > { %940 = vmatprep.mubr.f32.mxu1 %v1499_v6 }
 0x1e1   : > { %v685_v24 = vpop.f32.mrf.mxu0 }
 0x1e2   : > { %v762_v25 = vpop.f32.mrf.mxu1  ;;  %v686_v40 = vadd.f32 %v685_v24, %v592_v31 }
 0x1e3   : > { %v687_v26 = vpop.f32.mrf.mxu0  ;;  %v763_v41 = vadd.f32 %v762_v25, %v592_v31 }
 0x1e4   : > { %v764_v27 = vpop.f32.mrf.mxu1  ;;  %v688_v36 = vadd.f32 %v687_v26, %v592_v31  ;;  %v773_v48 = vmax.f32 %v686_v40, 0.0 }
 0x1e5   : > { %v691_v28 = vpop.f32.mrf.mxu0  ;;  %v765_v37 = vadd.f32 %v764_v27, %v592_v31  ;;  %v775_v49 = vmax.f32 %v763_v41, 0.0 }
 0x1e6   : > { %v768_v29 = vpop.f32.mrf.mxu1  ;;  %v692_v32 = vadd.f32 %v691_v28, %v597_v30  ;;  %v774_v46 = vmax.f32 %v688_v36, 0.0 }
 0x1e7   : > { %v769_v33 = vadd.f32 %v768_v29, %v597_v30  ;;  %v693_v34 = vpop.f32.mrf.mxu0  ;;  %v776_v47 = vmax.f32 %v765_v37, 0.0 }
 0x1e8   : > { %v770_v35 = vpop.f32.mrf.mxu1  ;;  %v694_v38 = vadd.f32 %v693_v34, %v597_v30  ;;  %v777_v44 = vmax.f32 %v692_v32, 0.0 }
 0x1e9   : > { %v771_v39 = vadd.f32 %v770_v35, %v597_v30  ;;  %v779_v45 = vmax.f32 %v769_v33, 0.0 }
 0x1ea   : > { %v778_v42 = vmax.f32 %v694_v38, 0.0 }
 0x1eb   : > { %v780_v43 = vmax.f32 %v771_v39, 0.0 }
 0x1ec   : > { %1302 = vmatprep.subr.msk.mxu0 %vm792_vm3, %v778_v42 }
 0x1ed   : > { %1305 = vmatprep.subr.msk.mxu1 %vm792_vm3, %v780_v43  ;;  %1303 = vmatpush1.msk.msra.mxu0 %vm792_vm3, %v777_v44 }
 0x1ee   : > { %1306 = vmatpush1.msk.msra.mxu1 %vm792_vm3, %v779_v45  ;;  %835 = vmatprep.subr.mxu0 %v774_v46 }
 0x1ef   : > { %906 = vmatprep.subr.mxu1 %v776_v47  ;;  %836 = vmatpush1.msra.mxu0 %v773_v48 }
 0x1f0   : > { %907 = vmatpush1.msra.mxu1 %v775_v49  ;;  %1304 = vmatmul.mubr.msk.f32.vlgmr.msra.gmra.mxu0 %vm788_vm4, %v781_v50 }
 0x1f1   : > { %1307 = vmatmul.mubr.msk.f32.vlgmr.msra.gmra.mxu1 %vm788_vm4, %v781_v50  ;;  %1047 = vmatprep.mubr.f32.mxu0 %v1499_v6 }
 0x1f2   : > { %1124 = vmatprep.mubr.f32.mxu1 %v1499_v6 }
 0x2b0   : > { %v871_v51 = vpop.f32.mrf.mxu0 }
 0x2b1   : > { %v942_v52 = vpop.f32.mrf.mxu1  ;;  %v872_v54 = vadd.f32 %v871_v51, %v786_v53 }
 0x2b2   : > { %v943_v55 = vadd.f32 %v942_v52, %v786_v53  ;;  %v873_v56 = vpop.f32.mrf.mxu0 }
 0x2b3   : > { %v944_v57 = vpop.f32.mrf.mxu1  ;;  %v874_v58 = vadd.f32 %v873_v56, %v786_v53  ;;  %v947_v62 = vmax.f32 %v872_v54, 0.0 }
 0x2b4   : > { %v945_v59 = vadd.f32 %v944_v57, %v786_v53  ;;  %v949_v63 = vmax.f32 %v943_v55, 0.0 }
 0x2b5   : > { %v948_v60 = vmax.f32 %v874_v58, 0.0 }
 0x2b6   : > { %v950_v61 = vmax.f32 %v945_v59, 0.0 }
 0x2b7   : > { %1308 = vmatprep.subr.msk.mxu0 %vm606_vm1, %v948_v60 }
 0x2b8   : > { %1312 = vmatprep.subr.msk.mxu1 %vm606_vm1, %v950_v61  ;;  %1309 = vmatpush1.msk.msra.mxu0 %vm606_vm1, %v947_v62 }
 0x2b9   : > { %1313 = vmatpush1.msk.msra.mxu1 %vm606_vm1, %v949_v63  ;;  %1310 = vmatmul.mubr.msk.f32.vlgmr.msra.gmra.mxu0 %vm599_vm2, %v951_v1 }
 0x2ba   : > { %1314 = vmatmul.mubr.msk.f32.vlgmr.msra.gmra.mxu1 %vm599_vm2, %v951_v1  ;;  %1053 = vmatprep.mubr.f32.mxu0 %v1499_v6 }
 0x2bb   : > { %1130 = vmatprep.mubr.f32.mxu1 %v1499_v6 }
 0x2bd   : > { %1311 = vmatmul.mubr.msk.f32.gmra.mxu0 %vm599_vm2, %v952_v2 }
 0x2be   : > { %1315 = vmatmul.mubr.msk.f32.gmra.mxu1 %vm599_vm2, %v952_v2 }
 0x379   : > { %v1049_v4 = vpop.f32.mrf.mxu0 }
 0x37a   : > { %v1126_v5 = vpop.f32.mrf.mxu1  ;;  %v1050_v7 = vadd.f32 %v1049_v4, %v958_v3 }
 0x37b   : > { %v1127_v8 = vadd.f32 %v1126_v5, %v958_v3  ;;  %v1051_v6 = vpop.f32.mrf.mxu0 }
 0x37c   : > { %v1128_v9 = vpop.f32.mrf.mxu1  ;;  %1137 = vst [vmem:[%s164_s10] sm:$0xff] %v1050_v7  ;;  %v1052_v10 = vadd.f32 %v1051_v6, %v958_v3 }
 0x37d   : > { %1139 = vst [vmem:[%s164_s10 + $0x10] sm:$0xff] %v1127_v8  ;;  %v1129_v11 = vadd.f32 %v1128_v9, %v958_v3  ;;  %v1055_v12 = vpop.f32.mrf.mxu0 }
 0x37e   : > { %v1132_v13 = vpop.f32.mrf.mxu1  ;;  %1138 = vst [vmem:[%s164_s10 + $0x8] sm:$0xff] %v1052_v10  ;;  %v1056_v14 = vadd.f32 %v1055_v12, %v963_v0 }
 0x37f   : > { %1140 = vst [vmem:[%s164_s10 + $0x18] sm:$0xff] %v1129_v11  ;;  %v1133_v15 = vadd.f32 %v1132_v13, %v963_v0  ;;  %v1057_v16 = vpop.f32.mrf.mxu0 }
 0x380   : > { %v1134_v17 = vpop.f32.mrf.mxu1  ;;  %1141 = vst [vmem:[%s164_s10 + $0x20] sm:$0x3] %v1056_v14  ;;  %v1058_v18 = vadd.f32 %v1057_v16, %v963_v0 }
 0x381   : > { %1143 = vst [vmem:[%s164_s10 + $0x30] sm:$0x3] %v1133_v15  ;;  %v1135_v19 = vadd.f32 %v1134_v17, %v963_v0 }
 0x382   : > { %1142 = vst [vmem:[%s164_s10 + $0x28] sm:$0x3] %v1058_v18 }
 0x383   : > { %1144 = vst [vmem:[%s164_s10 + $0x38] sm:$0x3] %v1135_v19 }
 0x384   : > { %1449 = shalt.err (!%p1446_p3)
}
 0x385   : > { %s1450_s29 = scalar_lea.hbm %s1787_s24, 1024  ;;  %s1454_s5 = scalar_lea.hbm %s1834_s3, 5120 }
 0x386   : > { %p1451_p4 = scmp.ne.s32.totalorder %s1787_s24, %s1450_s29  ;;  %p1455_p9 = scmp.lt.s32.totalorder %s1787_s24, %s1834_s3 }
 0x387   : > { %p1456_p10 = scmp.lt.s32.totalorder %s1454_s5, %s1450_s29 }
 0x388   : > { %p1452_p7 = pnand %p1451_p4, %p1562_p5 }
 0x389   : > { %p1457_p11 = por %p1456_p10, %p1455_p9 }
 0x38a   : > { %p1453_p8 = pneg %p1452_p7 }
 0x38c   : > { %p1458_p12 = pnand %p1457_p11, %p1453_p8 }
 0x38e   : > { %1461 = shalt.err (!%p1458_p12)
}
 0x38f   : > { %s1501_s8 = smov 512   ;;  %s1502_s9 = smov 2560  }
 0x390   : > { %s1503_s10 = smov 32  }
 0x391   : > { %1390 = dma.vmem_to_hbm [thread:$0]  (%p1562_p5), %s1782_s11, 1024, %s1787_s24, %s1791_s16, %s1501_s8, %s1502_s9, %s1503_s10  }
 0x392 PF: > { %p1396_p13 = scmp.ge.s32.totalorder %s1496_s15, 2  ;;  %s1174_s17 = sand.u32 1, %s1484_s12  }
 0x393   : > { %s1175_s19 = scalar_lea.sflag [#allocation3], %s1174_s17 }
 0x394   : > { %p1393_p0 = pnand %p1396_p13, %p1566_p6 }
 0x396   : > { %p1394_p1 = pneg %p1393_p0 }
 0x398   : > { %1479 = dma.done.wait (%p1394_p1), %s1175_s19, 1024  }
 0x399   : > { %1481 = vsyncadd (%p1394_p1), %s1175_s19, 4294966272  ;;  %p13_p2 = scmp.ge.s32.totalorder %s1549_s18, 7   ;;  %s1837_s12 = smov %s1488_s13 }
 0x39a   : > { %s1838_s13 = smov %s1492_s14  ;;  %s1839_s14 = smov %s1560_s21 }
 0x39b   : > { %s1840_s15 = smov %s1549_s18  ;;  %15 = sbr.rel (!%p13_p2) target bundleno = 3 (0x3), region = 67 }
 0x3a0   :  { %1180 = vsyncpa [#allocation3], 1 }
 0x3a1   :  { %1182 = vsyncpa [#allocation3 + $0x1], 1 }

</bundles_post_ra>
